<compile_context>
chip_gen: v6e
topology: v6e:2x2x1
jax: 0.10.0
libtpu: 0.0.40
codegen_flags: <defaults>
</compile_context>

<pallas_src>
import functools

import jax
import jax.numpy as jnp
from jax.experimental import pallas as pl
from jax.experimental.pallas import tpu as pltpu

CLASS_DIM = 3
DATA_DIM = 8
NH = 512
Z_DIM = 50

K1_PAD = 64      # padded (z_dim + class_dim) contraction dim  (53 -> 64)
OUT_PAD = 128    # padded output lane dim                      (8  -> 128)

NEG_SLOPE = 0.01  # nn.LeakyReLU() default negative_slope


def _leaky_relu(h):
    # max-form: identical math for 0 < slope < 1, but mul+max (2 VALU ops)
    # instead of cmp+mul+select (3 VALU ops).
    return jnp.maximum(h, NEG_SLOPE * h)


def generator_kernel(h_ref,
                     w1_ref, b1_ref, w2_ref, b2_ref,
                     w3_ref, b3_ref, w4_ref, b4_ref,
                     out_ref):
    """One batch tile: fused 4-layer MLP; all weights resident in VMEM."""
    cd = w1_ref.dtype                  # MXU compute dtype (bf16 default, f32 opt)

    # Layer 1: (tb, 64) @ (64, 512); input already cast to `cd` in the wrapper.
    h = jnp.dot(h_ref[...], w1_ref[...],
                preferred_element_type=jnp.float32) + b1_ref[...]
    h = _leaky_relu(h)
    # Layer 2: (tb, 512) @ (512, 256)
    h = jnp.dot(h.astype(cd), w2_ref[...],
                preferred_element_type=jnp.float32) + b2_ref[...]
    h = _leaky_relu(h)
    # Layer 3: (tb, 256) @ (256, 256)
    h = jnp.dot(h.astype(cd), w3_ref[...],
                preferred_element_type=jnp.float32) + b3_ref[...]
    h = _leaky_relu(h)
    # Layer 4 (head): (tb, 256) @ (256, 128)   (cols 8..127 are zero padding)
    h = jnp.dot(h.astype(cd), w4_ref[...],
                preferred_element_type=jnp.float32) + b4_ref[...]

    out_ref[...] = h.astype(out_ref.dtype)


def prepare_params(params, param_dtype=jnp.bfloat16):
    """One-time weight prep (pad + cast), hoisted out of the per-call hot path."""
    (w1, b1), (w2, b2), (w3, b3), (w4, b4) = params
    w1p = jnp.pad(w1, ((0, K1_PAD - w1.shape[0]), (0, 0))).astype(param_dtype)
    w4p = jnp.pad(w4, ((0, 0), (0, OUT_PAD - w4.shape[1]))).astype(param_dtype)
    b4p = jnp.pad(b4, ((0, 0), (0, OUT_PAD - b4.shape[1]))).astype(jnp.float32)
    return (w1p, b1.astype(jnp.float32),
            w2.astype(param_dtype), b2.astype(jnp.float32),
            w3.astype(param_dtype), b3.astype(jnp.float32),
            w4p, b4p)


def _round_up(x, m):
    return ((x + m - 1) // m) * m


def _choose_tiling(B, batch_tile):
    """Pick (tile_rows, num_steps): even >=2 steps (v7x megacore) when B > 8,
    tile a multiple of 128 on the large-batch path (full MXU M dim on v5e)."""
    if B <= 8:
        return 8, 1
    num_steps = _round_up(max(2, -(-B // batch_tile)), 2)
    rows = -(-B // num_steps)
    align = 128 if rows >= 128 else 8
    return max(align, _round_up(rows, align)), num_steps


@functools.partial(jax.jit, static_argnames=("batch_tile",))
def generator_forward(x, y, prepared_params, *, batch_tile=2048):
    """x: (B, Z_DIM) f32, y: (B, CLASS_DIM) f32 -> (B, DATA_DIM) f32."""
    B = x.shape[0]
    w1p, b1, w2, b2, w3, b3, w4p, b4p = prepared_params
    cd = w1p.dtype

    # Per-call input prep (data-dependent, stays in the jit): concat latent +
    # condition, zero-pad 53 -> 64, cast once to the MXU compute dtype.
    h_in = jnp.concatenate([x, y], axis=1)                        # (B, 53)
    h_in = jnp.pad(h_in, ((0, 0), (0, K1_PAD - h_in.shape[1]))).astype(cd)

    tb, num_steps = _choose_tiling(B, batch_tile)
    B_pad = tb * num_steps
    if B_pad != B:
        h_in = jnp.pad(h_in, ((0, B_pad - B), (0, 0)))

    def batch_spec(feat):
        return pl.BlockSpec((tb, feat), lambda i: (i, 0))

    def resident_spec(shape):
        # Constant block index -> block stays resident in VMEM across steps.
        # TODO(synk): pipeline_mode=pl.Buffered(1) would drop the second weight
        # buffer (~0.5 MB), but VMEM has >20 MiB headroom at tb=2048 so it is
        # skipped to keep the lowering maximally portable.
        return pl.BlockSpec(shape, lambda i: (0, 0))

    flops = 2 * B_pad * (K1_PAD * NH + NH * (NH // 2)
                         + (NH // 2) * (NH // 2) + (NH // 2) * OUT_PAD)
    weight_bytes = sum(a.size * a.dtype.itemsize for a in prepared_params)
    cost = pl.CostEstimate(
        flops=flops,
        transcendentals=0,
        bytes_accessed=weight_bytes
        + B_pad * K1_PAD * h_in.dtype.itemsize + B_pad * OUT_PAD * 4,
    )

    out_padded = pl.pallas_call(
        generator_kernel,
        out_shape=jax.ShapeDtypeStruct((B_pad, OUT_PAD), jnp.float32),
        grid_spec=pltpu.PrefetchScalarGridSpec(
            num_scalar_prefetch=0,
            grid=(num_steps,),
            in_specs=[
                batch_spec(K1_PAD),                         # concat+padded input
                resident_spec(w1p.shape), resident_spec(b1.shape),
                resident_spec(w2.shape), resident_spec(b2.shape),
                resident_spec(w3.shape), resident_spec(b3.shape),
                resident_spec(w4p.shape), resident_spec(b4p.shape),
            ],
            out_specs=batch_spec(OUT_PAD),
        ),
        compiler_params=pltpu.CompilerParams(
            dimension_semantics=("parallel",),
            vmem_limit_bytes=32 * 1024 * 1024),
        cost_estimate=cost,
    )(h_in, w1p, b1, w2, b2, w3, b3, w4p, b4p)

    # TODO(synk): consumers that accept the (B_pad, 128) padded layout can skip
    # this slice and save an extra XLA launch + HBM round trip.
    return out_padded[:B, :DATA_DIM]


def init_params(key):
    """Deterministic init mimicking PyTorch nn.Linear default U(-1/sqrt(fan_in), +)."""
    dims = [(Z_DIM + CLASS_DIM, NH), (NH, NH // 2),
            (NH // 2, NH // 2), (NH // 2, DATA_DIM)]
    params = []
    for fan_in, fan_out in dims:
        key, kw, kb = jax.random.split(key, 3)
        bound = 1.0 / (fan_in ** 0.5)
        w = jax.random.uniform(kw, (fan_in, fan_out), jnp.float32, -bound, bound)
        b = jax.random.uniform(kb, (1, fan_out), jnp.float32, -bound, bound)
        params.append((w, b))
    return params


def reference_forward(x, y, params):
    h = jnp.concatenate([x, y], axis=1)
    (w1, b1), (w2, b2), (w3, b3), (w4, b4) = params
    h = _leaky_relu(h @ w1 + b1)
    h = _leaky_relu(h @ w2 + b2)
    h = _leaky_relu(h @ w3 + b3)
    return h @ w4 + b4


if __name__ == "__main__":
    key = jax.random.PRNGKey(0)
    kp, kx, ky = jax.random.split(key, 3)
    params = init_params(kp)

    # --- f32 weights, small batch (2 tiles of 8 rows): tight check ---------
    B = 16
    x = jax.random.normal(kx, (B, Z_DIM), jnp.float32)            # latent noise
    labels = jax.random.randint(ky, (B,), 0, CLASS_DIM)
    y = jax.nn.one_hot(labels, CLASS_DIM, dtype=jnp.float32)      # class condition

    params_f32 = prepare_params(params, param_dtype=jnp.float32)
    out = jax.block_until_ready(generator_forward(x, y, params_f32))
    ref = reference_forward(x, y, params)
    assert out.shape == (B, DATA_DIM)
    assert jnp.allclose(out, ref, atol=1e-4, rtol=1e-4), "f32 mismatch vs reference"

    # --- bf16 default path, non-tile-divisible batch (2 x 256-row tiles) ---
    B2 = 300
    kx2, ky2 = jax.random.split(kx)
    x2 = jax.random.normal(kx2, (B2, Z_DIM), jnp.float32)
    y2 = jax.nn.one_hot(jax.random.randint(ky2, (B2,), 0, CLASS_DIM),
                        CLASS_DIM, dtype=jnp.float32)
    params_bf16 = prepare_params(params)               # bf16 weights (default)
    out2 = jax.block_until_ready(generator_forward(x2, y2, params_bf16))
    ref2 = reference_forward(x2, y2, params)
    assert out2.shape == (B2, DATA_DIM)
    assert jnp.allclose(out2, ref2, atol=5e-2, rtol=5e-2), "bf16 mismatch vs reference"

    print("KERNEL_OK")
</pallas_src>

<mosaic_0001>
module attributes {stable_mosaic.version = 11 : i64} {
  func.func @generator_kernel(%arg0: i32, %arg1: memref<8x64xf32, #tpu.memory_space<vmem>>, %arg2: memref<64x512xf32, #tpu.memory_space<vmem>>, %arg3: memref<1x512xf32, #tpu.memory_space<vmem>>, %arg4: memref<512x256xf32, #tpu.memory_space<vmem>>, %arg5: memref<1x256xf32, #tpu.memory_space<vmem>>, %arg6: memref<256x256xf32, #tpu.memory_space<vmem>>, %arg7: memref<1x256xf32, #tpu.memory_space<vmem>>, %arg8: memref<256x128xf32, #tpu.memory_space<vmem>>, %arg9: memref<1x128xf32, #tpu.memory_space<vmem>>, %arg10: memref<8x128xf32, #tpu.memory_space<vmem>>) attributes {dimension_semantics = [#tpu.dimension_semantics<parallel>], iteration_bounds = array<i64: 2>, scalar_prefetch = 0 : i64, scratch_operands = 0 : i64, tpu.core_type = #tpu.core_type<tc>, window_params = [{transform_indices = @transform_0, window_bounds = array<i64: 8, 64>}, {pipeline_mode = #tpu.pipeline_mode<synchronous>, transform_indices = @transform_1, window_bounds = array<i64: 64, 512>}, {pipeline_mode = #tpu.pipeline_mode<synchronous>, transform_indices = @transform_2, window_bounds = array<i64: 1, 512>}, {pipeline_mode = #tpu.pipeline_mode<synchronous>, transform_indices = @transform_3, window_bounds = array<i64: 512, 256>}, {pipeline_mode = #tpu.pipeline_mode<synchronous>, transform_indices = @transform_4, window_bounds = array<i64: 1, 256>}, {pipeline_mode = #tpu.pipeline_mode<synchronous>, transform_indices = @transform_5, window_bounds = array<i64: 256, 256>}, {pipeline_mode = #tpu.pipeline_mode<synchronous>, transform_indices = @transform_6, window_bounds = array<i64: 1, 256>}, {pipeline_mode = #tpu.pipeline_mode<synchronous>, transform_indices = @transform_7, window_bounds = array<i64: 256, 128>}, {pipeline_mode = #tpu.pipeline_mode<synchronous>, transform_indices = @transform_8, window_bounds = array<i64: 1, 128>}, {transform_indices = @transform_9, window_bounds = array<i64: 8, 128>}]} {
    %c0 = arith.constant 0 : index
    %c0_0 = arith.constant 0 : index
    %0 = vector.load %arg1[%c0, %c0_0] : memref<8x64xf32, #tpu.memory_space<vmem>>, vector<8x64xf32>
    %c0_1 = arith.constant 0 : index
    %c0_2 = arith.constant 0 : index
    %1 = vector.load %arg2[%c0_1, %c0_2] : memref<64x512xf32, #tpu.memory_space<vmem>>, vector<64x512xf32>
    %cst = arith.constant dense<0.000000e+00> : vector<8x512xf32>
    %2 = tpu.matmul %0, %1, %cst {dimension_numbers = #tpu.dot_dimension_numbers<[1], [0], [0], [1], [0, 0, 1, 1], [], []>} : vector<8x64xf32>, vector<64x512xf32>, vector<8x512xf32> -> vector<8x512xf32>
    %c0_3 = arith.constant 0 : index
    %c0_4 = arith.constant 0 : index
    %3 = vector.load %arg3[%c0_3, %c0_4] : memref<1x512xf32, #tpu.memory_space<vmem>>, vector<1x512xf32>
    %4 = vector.broadcast %3 : vector<1x512xf32> to vector<8x512xf32>
    %5 = arith.addf %2, %4 : vector<8x512xf32>
    %cst_5 = arith.constant 0.00999999977 : f32
    %6 = vector.broadcast %cst_5 : f32 to vector<8x512xf32>
    %7 = arith.mulf %6, %5 : vector<8x512xf32>
    %8 = arith.maximumf %5, %7 : vector<8x512xf32>
    %c0_6 = arith.constant 0 : index
    %c0_7 = arith.constant 0 : index
    %9 = vector.load %arg4[%c0_6, %c0_7] : memref<512x256xf32, #tpu.memory_space<vmem>>, vector<512x256xf32>
    %cst_8 = arith.constant dense<0.000000e+00> : vector<8x256xf32>
    %10 = tpu.matmul %8, %9, %cst_8 {dimension_numbers = #tpu.dot_dimension_numbers<[1], [0], [0], [1], [0, 0, 1, 1], [], []>} : vector<8x512xf32>, vector<512x256xf32>, vector<8x256xf32> -> vector<8x256xf32>
    %c0_9 = arith.constant 0 : index
    %c0_10 = arith.constant 0 : index
    %11 = vector.load %arg5[%c0_9, %c0_10] : memref<1x256xf32, #tpu.memory_space<vmem>>, vector<1x256xf32>
    %12 = vector.broadcast %11 : vector<1x256xf32> to vector<8x256xf32>
    %13 = arith.addf %10, %12 : vector<8x256xf32>
    %cst_11 = arith.constant 0.00999999977 : f32
    %14 = vector.broadcast %cst_11 : f32 to vector<8x256xf32>
    %15 = arith.mulf %14, %13 : vector<8x256xf32>
    %16 = arith.maximumf %13, %15 : vector<8x256xf32>
    %c0_12 = arith.constant 0 : index
    %c0_13 = arith.constant 0 : index
    %17 = vector.load %arg6[%c0_12, %c0_13] : memref<256x256xf32, #tpu.memory_space<vmem>>, vector<256x256xf32>
    %cst_14 = arith.constant dense<0.000000e+00> : vector<8x256xf32>
    %18 = tpu.matmul %16, %17, %cst_14 {dimension_numbers = #tpu.dot_dimension_numbers<[1], [0], [0], [1], [0, 0, 1, 1], [], []>} : vector<8x256xf32>, vector<256x256xf32>, vector<8x256xf32> -> vector<8x256xf32>
    %c0_15 = arith.constant 0 : index
    %c0_16 = arith.constant 0 : index
    %19 = vector.load %arg7[%c0_15, %c0_16] : memref<1x256xf32, #tpu.memory_space<vmem>>, vector<1x256xf32>
    %20 = vector.broadcast %19 : vector<1x256xf32> to vector<8x256xf32>
    %21 = arith.addf %18, %20 : vector<8x256xf32>
    %cst_17 = arith.constant 0.00999999977 : f32
    %22 = vector.broadcast %cst_17 : f32 to vector<8x256xf32>
    %23 = arith.mulf %22, %21 : vector<8x256xf32>
    %24 = arith.maximumf %21, %23 : vector<8x256xf32>
    %c0_18 = arith.constant 0 : index
    %c0_19 = arith.constant 0 : index
    %25 = vector.load %arg8[%c0_18, %c0_19] : memref<256x128xf32, #tpu.memory_space<vmem>>, vector<256x128xf32>
    %cst_20 = arith.constant dense<0.000000e+00> : vector<8x128xf32>
    %26 = tpu.matmul %24, %25, %cst_20 {dimension_numbers = #tpu.dot_dimension_numbers<[1], [0], [0], [1], [0, 0, 1, 1], [], []>} : vector<8x256xf32>, vector<256x128xf32>, vector<8x128xf32> -> vector<8x128xf32>
    %c0_21 = arith.constant 0 : index
    %c0_22 = arith.constant 0 : index
    %27 = vector.load %arg9[%c0_21, %c0_22] : memref<1x128xf32, #tpu.memory_space<vmem>>, vector<1x128xf32>
    %28 = vector.broadcast %27 : vector<1x128xf32> to vector<8x128xf32>
    %29 = arith.addf %26, %28 : vector<8x128xf32>
    %c0_23 = arith.constant 0 : index
    %c0_24 = arith.constant 0 : index
    %30 = vector.load %arg10[%c0_23, %c0_24] : memref<8x128xf32, #tpu.memory_space<vmem>>, vector<8x128xf32>
    tpu.vector_store %arg10[%c0_23, %c0_24], %29 {strides = array<i32>} : memref<8x128xf32, #tpu.memory_space<vmem>>, vector<8x128xf32>,
    return
  }
  func.func @transform_0(%arg0: i32) -> (i32, i32) {
    %c0_i32 = arith.constant 0 : i32
    %c0_i32_0 = arith.constant 0 : i32
    return %arg0, %c0_i32 : i32, i32
  }
  func.func @transform_1(%arg0: i32) -> (i32, i32) {
    %c0_i32 = arith.constant 0 : i32
    %c0_i32_0 = arith.constant 0 : i32
    %c0_i32_1 = arith.constant 0 : i32
    return %c0_i32, %c0_i32_0 : i32, i32
  }
  func.func @transform_2(%arg0: i32) -> (i32, i32) {
    %c0_i32 = arith.constant 0 : i32
    %c0_i32_0 = arith.constant 0 : i32
    %c0_i32_1 = arith.constant 0 : i32
    return %c0_i32, %c0_i32_0 : i32, i32
  }
  func.func @transform_3(%arg0: i32) -> (i32, i32) {
    %c0_i32 = arith.constant 0 : i32
    %c0_i32_0 = arith.constant 0 : i32
    %c0_i32_1 = arith.constant 0 : i32
    return %c0_i32, %c0_i32_0 : i32, i32
  }
  func.func @transform_4(%arg0: i32) -> (i32, i32) {
    %c0_i32 = arith.constant 0 : i32
    %c0_i32_0 = arith.constant 0 : i32
    %c0_i32_1 = arith.constant 0 : i32
    return %c0_i32, %c0_i32_0 : i32, i32
  }
  func.func @transform_5(%arg0: i32) -> (i32, i32) {
    %c0_i32 = arith.constant 0 : i32
    %c0_i32_0 = arith.constant 0 : i32
    %c0_i32_1 = arith.constant 0 : i32
    return %c0_i32, %c0_i32_0 : i32, i32
  }
  func.func @transform_6(%arg0: i32) -> (i32, i32) {
    %c0_i32 = arith.constant 0 : i32
    %c0_i32_0 = arith.constant 0 : i32
    %c0_i32_1 = arith.constant 0 : i32
    return %c0_i32, %c0_i32_0 : i32, i32
  }
  func.func @transform_7(%arg0: i32) -> (i32, i32) {
    %c0_i32 = arith.constant 0 : i32
    %c0_i32_0 = arith.constant 0 : i32
    %c0_i32_1 = arith.constant 0 : i32
    return %c0_i32, %c0_i32_0 : i32, i32
  }
  func.func @transform_8(%arg0: i32) -> (i32, i32) {
    %c0_i32 = arith.constant 0 : i32
    %c0_i32_0 = arith.constant 0 : i32
    %c0_i32_1 = arith.constant 0 : i32
    return %c0_i32, %c0_i32_0 : i32, i32
  }
  func.func @transform_9(%arg0: i32) -> (i32, i32) {
    %c0_i32 = arith.constant 0 : i32
    %c0_i32_0 = arith.constant 0 : i32
    return %arg0, %c0_i32 : i32, i32
  }
}

</mosaic_0001>

<bundles_post_ra>
// kernel: generator_forward.1
= control target key start
LH: loop header
LB: loop body
LE: loop exit
PB: predicated region body
PF: predicated region fallthrough
CT: control target
= control target key end

     0   :  { %14 = vsyncpa [#allocation3], 0  ;;  %s1666_s0 = inlined_call_operand.vmem [shape: f32[16,64], index: 0, kind: input, shape index: {}]   ;;  %s1667_s1 = inlined_call_operand.hbm [shape: f32[64,512], index: 1, kind: input, shape index: {}]   ;;  %s1668_s2 = inlined_call_operand.vmem [shape: f32[1,512], index: 2, kind: input, shape index: {}]   ;;  %s1669_s3 = inlined_call_operand.hbm [shape: f32[512,256], index: 3, kind: input, shape index: {}]   ;;  %s1670_s4 = inlined_call_operand.vmem [shape: f32[1,256], index: 4, kind: input, shape index: {}]   ;;  %s1671_s5 = inlined_call_operand.hbm [shape: f32[256,256], index: 5, kind: input, shape index: {}]   ;;  %s1672_s6 = inlined_call_operand.vmem [shape: f32[1,256], index: 6, kind: input, shape index: {}]   ;;  %s1673_s7 = inlined_call_operand.hbm [shape: f32[256,128], index: 7, kind: input, shape index: {}]   ;;  %s1674_s8 = inlined_call_operand.vmem [shape: f32[1,128], index: 8, kind: input, shape index: {}]   ;;  %s1675_s9 = inlined_call_operand.vmem [shape: f32[16,128], index: 9, kind: output, shape index: {}]  }
   0x1   :  { %15 = vsyncpa [#allocation5], 0 }
   0x2   :  { %16 = vsyncpa [#allocation8], 0  ;;  %s1533_s30 = smov 0  }
   0x3 LB: > { %s1472_s10 = smov [#allocation4]   ;;  %s1539_s12 = sadd.s32 4294967295, %s1470_s30   ;;  %s1470_s30 = sphi %s1533_s30, %s22_s30  }
   0x4   : > { %s275_s11 = sshll.u32 %s1472_s10, 4  ;;  %p1239_p0 = scmp.ge.s32.totalorder %s1470_s30, 1  ;;  %s276_s11 = int_to_ptr.vmem [resolvable:$true] %s275_s11 }
   0x5   : > { %p247_p1 = scmp.lt.s32.totalorder %s1470_s30, 3  ;;  %p1321_p2 = scmp.eq.s32.totalorder %s1539_s12, 0 }
   0x6   : > { %s1473_s14 = smov [#allocation2]   ;;  %s1474_s17 = smov [#allocation6]  }
   0x7   : > { %p1544_p3 = pnand %p1239_p0, %p247_p1  ;;  %s259_s15 = sshll.u32 %s1473_s14, 4  ;;  %s1550_s15 = int_to_ptr.vmem [resolvable:$true] %s259_s15 }
   0x8   : > { %s1558_s18 = sshll.u32 %s1474_s17, 4  ;;  %s1359_s19 = scalar_lea.vmem %s276_s11, 16384  ;;  %s292_s18 = int_to_ptr.vmem [resolvable:$true] %s1558_s18 }
   0x9   : > { %p1308_p4 = pneg %p1544_p3  ;;  %p1360_p7 = scmp.ne.s32.totalorder %s276_s11, %s1359_s19 }
   0xa   : > { %p1367_p10 = scmp.lt.s32.totalorder %s276_s11, %s276_s11  ;;  %p1368_p11 = scmp.lt.s32.totalorder %s1359_s19, %s1359_s19 }
   0xb   : > { %p1554_p5 = pnand %p1321_p2, %p1308_p4 }
   0xc   : > { %p1369_p12 = por %p1368_p11, %p1367_p10 }
   0xd   : > { %p1350_p6 = pneg %p1554_p5 }
   0xf   : > { %p1362_p8 = pnand %p1360_p7, %p1350_p6 }
  0x11   : > { %p1363_p9 = pneg %p1362_p8 }
  0x13   : > { %p1370_p13 = pnand %p1369_p12, %p1363_p9 }
  0x15   : > { %1373 = shalt.err (!%p1370_p13)
}
  0x16   : > { %s1475_s20 = smov 256   ;;  %s1476_s21 = smov 16  }
  0x17   : > { %1314 = dma.hbm_to_vmem [thread:$0]  (!%p1554_p5), %s1669_s3, 16384, %s276_s11, [#allocation5], %s1475_s20, %s1475_s20, %s1476_s21  }
  0x18   : > { %s1385_s24 = scalar_lea.vmem %s1550_s15, 4096  ;;  %p1393_p7 = scmp.lt.s32.totalorder %s1550_s15, %s1550_s15 }
  0x19   : > { %p1386_p0 = scmp.ne.s32.totalorder %s1550_s15, %s1385_s24  ;;  %p1394_p8 = scmp.lt.s32.totalorder %s1385_s24, %s1385_s24 }
  0x1b   : > { %p1388_p1 = pnand %p1386_p0, %p1350_p6  ;;  %p1395_p9 = por %p1394_p8, %p1393_p7 }
  0x1d   : > { %p1389_p4 = pneg %p1388_p1 }
  0x1f   : > { %p1396_p10 = pnand %p1395_p9, %p1389_p4 }
  0x21   : > { %1399 = shalt.err (!%p1396_p10)
}
  0x22   : > { %s1477_s25 = smov 512   ;;  %s1478_s26 = smov 32  }
  0x23   : > { %1311 = dma.hbm_to_vmem [thread:$0]  (!%p1554_p5), %s1667_s1, 4096, %s1550_s15, [#allocation3], %s1477_s25, %s1477_s25, %s1478_s26  }
  0x24   : > { %s1479_s29 = smov [#allocation7]   ;;  %s1411_s11 = scalar_lea.vmem %s292_s18, 8192 }
  0x25   : > { %s307_s10 = sshll.u32 %s1479_s29, 4  ;;  %p1412_p11 = scmp.ne.s32.totalorder %s292_s18, %s1411_s11  ;;  %s308_s10 = int_to_ptr.vmem [resolvable:$true] %s307_s10 }
  0x26   : > { %p1419_p0 = scmp.lt.s32.totalorder %s292_s18, %s292_s18  ;;  %p1420_p1 = scmp.lt.s32.totalorder %s1411_s11, %s1411_s11 }
  0x27   : > { %p1414_p12 = pnand %p1412_p11, %p1350_p6 }
  0x28   : > { %p1421_p4 = por %p1420_p1, %p1419_p0 }
  0x29   : > { %p1415_p13 = pneg %p1414_p12 }
  0x2b   : > { %p1422_p7 = pnand %p1421_p4, %p1415_p13 }
  0x2d   : > { %1425 = shalt.err (!%p1422_p7)
}
  0x2e   : > { %1317 = dma.hbm_to_vmem [thread:$0]  (!%p1554_p5), %s1671_s5, 8192, %s292_s18, [#allocation5], %s1475_s20, %s1475_s20, %s1476_s21  }
  0x2f   : > { %s1437_s17 = scalar_lea.vmem %s308_s10, 4096  ;;  %p1445_p11 = scmp.lt.s32.totalorder %s308_s10, %s308_s10 }
  0x30   : > { %p1438_p8 = scmp.ne.s32.totalorder %s308_s10, %s1437_s17  ;;  %p1446_p12 = scmp.lt.s32.totalorder %s1437_s17, %s1437_s17 }
  0x32   : > { %p1440_p9 = pnand %p1438_p8, %p1350_p6  ;;  %p1447_p13 = por %p1446_p12, %p1445_p11 }
  0x34   : > { %p1441_p10 = pneg %p1440_p9 }
  0x36   : > { %p1448_p0 = pnand %p1447_p13, %p1441_p10 }
  0x38   : > { %1451 = shalt.err (!%p1448_p0)
}
  0x39   : > { %s1480_s19 = smov 128   ;;  %s1481_s22 = smov 8  }
  0x3a   : > { %1320 = dma.hbm_to_vmem [thread:$0]  (!%p1554_p5), %s1673_s7, 4096, %s308_s10, [#allocation8], %s1480_s19, %s1480_s19, %s1481_s22  }
  0x3b   : > { %333 = sbr.rel (%p1544_p3) target bundleno = 908 (0x38c), region = 56 }
  0x40   : > { %1457 = dma.done.wait (%p1321_p2), [#allocation3], 4096  }
  0x41   : > { %1459 = vsyncadd (%p1321_p2), [#allocation3], 4294963200 }
  0x42   : > { %1461 = dma.done.wait (%p1321_p2), [#allocation5], 24576  }
  0x43   : > { %1463 = vsyncadd (%p1321_p2), [#allocation5], 4294942720 }
  0x44   : > { %1465 = dma.done.wait (%p1321_p2), [#allocation8], 4096  }
  0x45   : > { %1467 = vsyncadd (%p1321_p2), [#allocation8], 4294963200  ;;  %v1482_v0 = vmov 0.0   ;;  %v417_v1 = vld [vmem:[#allocation2 + $0xe8] sm:$0xff]  ;;  %v416_v2 = vld [vmem:[#allocation2 + $0xe0] sm:$0xff]  ;;  %p379_p3 = scmp.lt.s32.totalorder %s1539_s12, 1 }
  0x46   : > { %510 = vmatprep.mubr.f32.mxu1 %v1482_v0  ;;  %v413_v3 = vld [vmem:[#allocation2 + $0xc8] sm:$0xff]  ;;  %462 = vmatprep.subr.mxu1 %v417_v1  ;;  %v412_v4 = vld [vmem:[#allocation2 + $0xc0] sm:$0xff]  ;;  %v627_v15 = vld [vmem:[#allocation4 + $0xf8] sm:$0xff]  ;;  %vm442_vm0 = vcmask 523264  }
  0x47   : > { %463 = vmatpush1.msra.mxu1 %v416_v2  ;;  %v409_v5 = vld [vmem:[#allocation2 + $0xa8] sm:$0xff]  ;;  %v408_v6 = vld [vmem:[#allocation2 + $0xa0] sm:$0xff]  ;;  %s1679_s12 = smov (!%p379_p3, %s1539_s12), 1  ;;  %v626_v16 = vld [vmem:[#allocation4 + $0xf0] sm:$0xff]  ;;  %736 = vmatprep.subr.mxu0 %v627_v15 }
  0x48   : > { %464 = vmatprep.subr.mxu1 %v413_v3  ;;  %v405_v7 = vld [vmem:[#allocation2 + $0x88] sm:$0xff]  ;;  %v404_v8 = vld [vmem:[#allocation2 + $0x80] sm:$0xff]  ;;  %s1250_s13 = sshll.u32 %s1679_s12, 3  ;;  %737 = vmatpush1.msra.mxu0 %v626_v16  ;;  %v623_v21 = vld [vmem:[#allocation4 + $0xd8] sm:$0xff] }
  0x49   : > { %465 = vmatpush1.msra.mxu1 %v412_v4  ;;  %v401_v9 = vld [vmem:[#allocation2 + $0x68] sm:$0xff]  ;;  %v400_v10 = vld [vmem:[#allocation2 + $0x60] sm:$0xff]  ;;  %s382_s20 = scalar_lea.vmem %s1666_s0, %s1250_s13  ;;  %v419_v23 = vld [vmem:[#allocation2 + $0xf8] sm:$0xff]  ;;  %s386_s17 = scalar_lea.vmem %s1675_s9, %s1250_s13 }
  0x4a   : > { %466 = vmatprep.subr.mxu1 %v409_v5  ;;  %v397_v11 = vld [vmem:[#allocation2 + $0x48] sm:$0xff]  ;;  %v396_v12 = vld [vmem:[#allocation2 + $0x40] sm:$0xff]  ;;  %v418_v24 = vld [vmem:[#allocation2 + $0xf0] sm:$0xff] }
  0x4b   : > { %467 = vmatpush1.msra.mxu1 %v408_v6  ;;  %v393_v13 = vld [vmem:[#allocation2 + $0x28] sm:$0xff]  ;;  %v392_v14 = vld [vmem:[#allocation2 + $0x20] sm:$0xff]  ;;  %v415_v25 = vld [vmem:[#allocation2 + $0xd8] sm:$0xff] }
  0x4c   : > { %468 = vmatprep.subr.mxu1 %v405_v7  ;;  %v625_v17 = vld [vmem:[#allocation4 + $0xe8] sm:$0xff]  ;;  %v624_v19 = vld [vmem:[#allocation4 + $0xe0] sm:$0xff]  ;;  %v622_v26 = vld [vmem:[#allocation4 + $0xd0] sm:$0xff] }
  0x4d   : > { %469 = vmatpush1.msra.mxu1 %v404_v8  ;;  %v389_v18 = vld [vmem:[#allocation2 + $0x8] sm:$0xff]  ;;  %v388_v20 = vld [vmem:[#allocation2] sm:$0xff]  ;;  %738 = vmatprep.subr.mxu0 %v625_v17  ;;  %v414_v27 = vld [vmem:[#allocation2 + $0xd0] sm:$0xff] }
  0x4e   : > { %470 = vmatprep.subr.mxu1 %v401_v9  ;;  %v1630_v22 = vld [vmem:[%s382_s20] sm:$0xff]  ;;  %739 = vmatpush1.msra.mxu0 %v624_v19  ;;  %v621_v28 = vld [vmem:[#allocation4 + $0xc8] sm:$0xff]  ;;  %v411_v29 = vld [vmem:[#allocation2 + $0xb8] sm:$0xff] }
  0x4f   : > { %471 = vmatpush1.msra.mxu1 %v400_v10  ;;  %740 = vmatprep.subr.mxu0 %v623_v21  ;;  %v620_v30 = vld [vmem:[#allocation4 + $0xc0] sm:$0xff]  ;;  %v410_v31 = vld [vmem:[#allocation2 + $0xb0] sm:$0xff]  ;;  %v619_v32 = vld [vmem:[#allocation4 + $0xb8] sm:$0xff] }
  0x50   : > { %472 = vmatprep.subr.mxu1 %v397_v11  ;;  %741 = vmatpush1.msra.mxu0 %v622_v26  ;;  %v407_v33 = vld [vmem:[#allocation2 + $0x98] sm:$0xff]  ;;  %v618_v34 = vld [vmem:[#allocation4 + $0xb0] sm:$0xff]  ;;  %v617_v36 = vld [vmem:[#allocation4 + $0xa8] sm:$0xff] }
  0x51   : > { %473 = vmatpush1.msra.mxu1 %v396_v12  ;;  %742 = vmatprep.subr.mxu0 %v621_v28  ;;  %v406_v35 = vld [vmem:[#allocation2 + $0x90] sm:$0xff]  ;;  %v403_v37 = vld [vmem:[#allocation2 + $0x78] sm:$0xff]  ;;  %v616_v38 = vld [vmem:[#allocation4 + $0xa0] sm:$0xff] }
  0x52   : > { %474 = vmatprep.subr.mxu1 %v393_v13  ;;  %743 = vmatpush1.msra.mxu0 %v620_v30  ;;  %v402_v39 = vld [vmem:[#allocation2 + $0x70] sm:$0xff]  ;;  %v615_v40 = vld [vmem:[#allocation4 + $0x98] sm:$0xff]  ;;  %v613_v44 = vld [vmem:[#allocation4 + $0x88] sm:$0xff] }
  0x53   : > { %475 = vmatpush1.msra.mxu1 %v392_v14  ;;  %744 = vmatprep.subr.mxu0 %v619_v32  ;;  %v399_v41 = vld [vmem:[#allocation2 + $0x58] sm:$0xff]  ;;  %v614_v42 = vld [vmem:[#allocation4 + $0x90] sm:$0xff]  ;;  %v612_v46 = vld [vmem:[#allocation4 + $0x80] sm:$0xff] }
  0x54   : > { %476 = vmatprep.subr.mxu1 %v389_v18  ;;  %745 = vmatpush1.msra.mxu0 %v618_v34  ;;  %v398_v43 = vld [vmem:[#allocation2 + $0x50] sm:$0xff]  ;;  %v395_v45 = vld [vmem:[#allocation2 + $0x38] sm:$0xff]  ;;  %v609_v52 = vld [vmem:[#allocation4 + $0x68] sm:$0xff] }
  0x55   : > { %477 = vmatpush1.msra.mxu1 %v388_v20  ;;  %746 = vmatprep.subr.mxu0 %v617_v36  ;;  %v394_v47 = vld [vmem:[#allocation2 + $0x30] sm:$0xff]  ;;  %v611_v48 = vld [vmem:[#allocation4 + $0x78] sm:$0xff]  ;;  %v608_v55 = vld [vmem:[#allocation4 + $0x60] sm:$0xff] }
  0x56   : > { %1252 = vmatmul.mubr.msk.f32.vlgmr.msra.gmra.mxu1 %vm442_vm0, %v1630_v22  ;;  %533 = vmatprep.subr.mxu1 %v419_v23  ;;  %v391_v49 = vld [vmem:[#allocation2 + $0x18] sm:$0xff]  ;;  %v610_v50 = vld [vmem:[#allocation4 + $0x70] sm:$0xff]  ;;  %v689_v56 = vld [vmem:[#allocation4 + $0x2e8] sm:$0xff] }
  0x57   : > { %534 = vmatpush1.msra.mxu1 %v418_v24  ;;  %581 = vmatprep.mubr.f32.mxu1 %v1482_v0  ;;  %v390_v51 = vld [vmem:[#allocation2 + $0x10] sm:$0xff]  ;;  %v691_v53 = vld [vmem:[#allocation4 + $0x2f8] sm:$0xff]  ;;  %v688_v58 = vld [vmem:[#allocation4 + $0x2e0] sm:$0xff] }
  0x58   : > { %535 = vmatprep.subr.mxu1 %v415_v25  ;;  %747 = vmatpush1.msra.mxu0 %v616_v38  ;;  %v690_v54 = vld [vmem:[#allocation4 + $0x2f0] sm:$0xff]  ;;  %v607_v57 = vld [vmem:[#allocation4 + $0x58] sm:$0xff]  ;;  %v605_v61 = vld [vmem:[#allocation4 + $0x48] sm:$0xff] }
  0x59   : > { %536 = vmatpush1.msra.mxu1 %v414_v27  ;;  %748 = vmatprep.subr.mxu0 %v615_v40  ;;  %v606_v59 = vld [vmem:[#allocation4 + $0x50] sm:$0xff]  ;;  %v687_v60 = vld [vmem:[#allocation4 + $0x2d8] sm:$0xff]  ;;  %v604_v63 = vld [vmem:[#allocation4 + $0x40] sm:$0xff] }
  0x5a   : > { %537 = vmatprep.subr.mxu1 %v411_v29  ;;  %749 = vmatpush1.msra.mxu0 %v614_v42  ;;  %v686_v62 = vld [vmem:[#allocation4 + $0x2d0] sm:$0xff]  ;;  %v685_v0 = vld [vmem:[#allocation4 + $0x2c8] sm:$0xff]  ;;  %v603_v1 = vld [vmem:[#allocation4 + $0x38] sm:$0xff] }
  0x5b   : > { %538 = vmatpush1.msra.mxu1 %v410_v31  ;;  %750 = vmatprep.subr.mxu0 %v613_v44  ;;  %v684_v2 = vld [vmem:[#allocation4 + $0x2c0] sm:$0xff]  ;;  %v602_v3 = vld [vmem:[#allocation4 + $0x30] sm:$0xff]  ;;  %v683_v4 = vld [vmem:[#allocation4 + $0x2b8] sm:$0xff] }
  0x5c   : > { %539 = vmatprep.subr.mxu1 %v407_v33  ;;  %751 = vmatpush1.msra.mxu0 %v612_v46  ;;  %v601_v5 = vld [vmem:[#allocation4 + $0x28] sm:$0xff]  ;;  %v682_v6 = vld [vmem:[#allocation4 + $0x2b0] sm:$0xff]  ;;  %v600_v7 = vld [vmem:[#allocation4 + $0x20] sm:$0xff] }
  0x5d   : > { %540 = vmatpush1.msra.mxu1 %v406_v35  ;;  %752 = vmatprep.subr.mxu0 %v611_v48  ;;  %v681_v8 = vld [vmem:[#allocation4 + $0x2a8] sm:$0xff]  ;;  %v599_v9 = vld [vmem:[#allocation4 + $0x18] sm:$0xff]  ;;  %v680_v10 = vld [vmem:[#allocation4 + $0x2a0] sm:$0xff] }
  0x5e   : > { %541 = vmatprep.subr.mxu1 %v403_v37  ;;  %753 = vmatpush1.msra.mxu0 %v610_v50  ;;  %v598_v11 = vld [vmem:[#allocation4 + $0x10] sm:$0xff]  ;;  %v679_v12 = vld [vmem:[#allocation4 + $0x298] sm:$0xff]  ;;  %v597_v13 = vld [vmem:[#allocation4 + $0x8] sm:$0xff] }
  0x5f   : > { %542 = vmatpush1.msra.mxu1 %v402_v39  ;;  %754 = vmatprep.subr.mxu0 %v609_v52  ;;  %v678_v14 = vld [vmem:[#allocation4 + $0x290] sm:$0xff]  ;;  %v596_v15 = vld [vmem:[#allocation4] sm:$0xff]  ;;  %v677_v16 = vld [vmem:[#allocation4 + $0x288] sm:$0xff] }
  0x60   : > { %543 = vmatprep.subr.mxu1 %v399_v41  ;;  %755 = vmatpush1.msra.mxu0 %v608_v55  ;;  %v659_v17 = vld [vmem:[#allocation4 + $0x1f8] sm:$0xff]  ;;  %v676_v18 = vld [vmem:[#allocation4 + $0x280] sm:$0xff]  ;;  %v658_v19 = vld [vmem:[#allocation4 + $0x1f0] sm:$0xff] }
  0x61   : > { %544 = vmatpush1.msra.mxu1 %v398_v43  ;;  %756 = vmatprep.subr.mxu0 %v607_v57  ;;  %v675_v20 = vld [vmem:[#allocation4 + $0x278] sm:$0xff]  ;;  %v657_v21 = vld [vmem:[#allocation4 + $0x1e8] sm:$0xff]  ;;  %v656_v23 = vld [vmem:[#allocation4 + $0x1e0] sm:$0xff] }
  0x62   : > { %545 = vmatprep.subr.mxu1 %v395_v45  ;;  %757 = vmatpush1.msra.mxu0 %v606_v59  ;;  %v673_v24 = vld [vmem:[#allocation4 + $0x268] sm:$0xff]  ;;  %v655_v25 = vld [vmem:[#allocation4 + $0x1d8] sm:$0xff]  ;;  %v672_v26 = vld [vmem:[#allocation4 + $0x260] sm:$0xff] }
  0x63   : > { %546 = vmatpush1.msra.mxu1 %v394_v47  ;;  %758 = vmatprep.subr.mxu0 %v605_v61  ;;  %v654_v27 = vld [vmem:[#allocation4 + $0x1d0] sm:$0xff]  ;;  %v671_v28 = vld [vmem:[#allocation4 + $0x258] sm:$0xff]  ;;  %v653_v29 = vld [vmem:[#allocation4 + $0x1c8] sm:$0xff] }
  0x64   : > { %547 = vmatprep.subr.mxu1 %v391_v49  ;;  %759 = vmatpush1.msra.mxu0 %v604_v63  ;;  %v670_v30 = vld [vmem:[#allocation4 + $0x250] sm:$0xff]  ;;  %v652_v31 = vld [vmem:[#allocation4 + $0x1c0] sm:$0xff]  ;;  %v669_v32 = vld [vmem:[#allocation4 + $0x248] sm:$0xff] }
  0x65   : > { %548 = vmatpush1.msra.mxu1 %v390_v51  ;;  %760 = vmatprep.subr.mxu0 %v603_v1  ;;  %v651_v33 = vld [vmem:[#allocation4 + $0x1b8] sm:$0xff]  ;;  %v668_v34 = vld [vmem:[#allocation4 + $0x240] sm:$0xff]  ;;  %v650_v35 = vld [vmem:[#allocation4 + $0x1b0] sm:$0xff] }
  0x66   : > { %1253 = vmatmul.mubr.msk.f32.vlgmr.msra.gmra.mxu1 %vm442_vm0, %v1630_v22  ;;  %807 = vmatprep.subr.mxu1 %v691_v53  ;;  %v674_v22 = vld [vmem:[#allocation4 + $0x270] sm:$0xff]  ;;  %v667_v36 = vld [vmem:[#allocation4 + $0x238] sm:$0xff]  ;;  %v649_v37 = vld [vmem:[#allocation4 + $0x1a8] sm:$0xff] }
  0x67   : > { %808 = vmatpush1.msra.mxu1 %v690_v54  ;;  %761 = vmatpush1.msra.mxu0 %v602_v3  ;;  %v666_v38 = vld [vmem:[#allocation4 + $0x230] sm:$0xff]  ;;  %v648_v39 = vld [vmem:[#allocation4 + $0x1a0] sm:$0xff]  ;;  %v665_v40 = vld [vmem:[#allocation4 + $0x228] sm:$0xff] }
  0x68   : > { %809 = vmatprep.subr.mxu1 %v689_v56  ;;  %762 = vmatprep.subr.mxu0 %v601_v5  ;;  %v647_v41 = vld [vmem:[#allocation4 + $0x198] sm:$0xff]  ;;  %v664_v42 = vld [vmem:[#allocation4 + $0x220] sm:$0xff]  ;;  %v646_v43 = vld [vmem:[#allocation4 + $0x190] sm:$0xff] }
  0x69   : > { %810 = vmatpush1.msra.mxu1 %v688_v58  ;;  %763 = vmatpush1.msra.mxu0 %v600_v7  ;;  %v663_v44 = vld [vmem:[#allocation4 + $0x218] sm:$0xff]  ;;  %v645_v45 = vld [vmem:[#allocation4 + $0x188] sm:$0xff]  ;;  %v662_v46 = vld [vmem:[#allocation4 + $0x210] sm:$0xff] }
  0x6a   : > { %811 = vmatprep.subr.mxu1 %v687_v60  ;;  %764 = vmatprep.subr.mxu0 %v599_v9  ;;  %v644_v47 = vld [vmem:[#allocation4 + $0x180] sm:$0xff]  ;;  %v661_v48 = vld [vmem:[#allocation4 + $0x208] sm:$0xff]  ;;  %v643_v49 = vld [vmem:[#allocation4 + $0x178] sm:$0xff] }
  0x6b   : > { %812 = vmatpush1.msra.mxu1 %v686_v62  ;;  %765 = vmatpush1.msra.mxu0 %v598_v11  ;;  %v660_v50 = vld [vmem:[#allocation4 + $0x200] sm:$0xff]  ;;  %v642_v51 = vld [vmem:[#allocation4 + $0x170] sm:$0xff]  ;;  %v723_v52 = vld [vmem:[#allocation4 + $0x3f8] sm:$0xff] }
  0x6c   : > { %813 = vmatprep.subr.mxu1 %v685_v0  ;;  %766 = vmatprep.subr.mxu0 %v597_v13  ;;  %v641_v53 = vld [vmem:[#allocation4 + $0x168] sm:$0xff]  ;;  %v722_v54 = vld [vmem:[#allocation4 + $0x3f0] sm:$0xff]  ;;  %v640_v55 = vld [vmem:[#allocation4 + $0x160] sm:$0xff] }
  0x6d   : > { %814 = vmatpush1.msra.mxu1 %v684_v2  ;;  %767 = vmatpush1.msra.mxu0 %v596_v15  ;;  %v721_v56 = vld [vmem:[#allocation4 + $0x3e8] sm:$0xff]  ;;  %v639_v57 = vld [vmem:[#allocation4 + $0x158] sm:$0xff]  ;;  %v720_v58 = vld [vmem:[#allocation4 + $0x3e0] sm:$0xff] }
  0x6e   : > { %815 = vmatprep.subr.mxu1 %v683_v4  ;;  %768 = vmatprep.subr.mxu0 %v659_v17  ;;  %v638_v59 = vld [vmem:[#allocation4 + $0x150] sm:$0xff]  ;;  %v719_v60 = vld [vmem:[#allocation4 + $0x3d8] sm:$0xff]  ;;  %v637_v62 = vld [vmem:[#allocation4 + $0x148] sm:$0xff] }
  0x6f   : > { %816 = vmatpush1.msra.mxu1 %v682_v6  ;;  %769 = vmatpush2.msra.mxu0 %v658_v19  ;;  %v718_v61 = vld [vmem:[#allocation4 + $0x3d0] sm:$0xff]  ;;  %v717_v63 = vld [vmem:[#allocation4 + $0x3c8] sm:$0xff]  ;;  %v636_v0 = vld [vmem:[#allocation4 + $0x140] sm:$0xff] }
  0x70   : > { %817 = vmatprep.subr.mxu1 %v681_v8  ;;  %770 = vmatprep.subr.mxu0 %v657_v21  ;;  %v716_v1 = vld [vmem:[#allocation4 + $0x3c0] sm:$0xff]  ;;  %v635_v2 = vld [vmem:[#allocation4 + $0x138] sm:$0xff]  ;;  %v634_v4 = vld [vmem:[#allocation4 + $0x130] sm:$0xff] }
  0x71   : > { %818 = vmatpush1.msra.mxu1 %v680_v10  ;;  %771 = vmatpush2.msra.mxu0 %v656_v23  ;;  %v715_v3 = vld [vmem:[#allocation4 + $0x3b8] sm:$0xff]  ;;  %v714_v5 = vld [vmem:[#allocation4 + $0x3b0] sm:$0xff]  ;;  %v633_v6 = vld [vmem:[#allocation4 + $0x128] sm:$0xff] }
  0x72   : > { %819 = vmatprep.subr.mxu1 %v679_v12  ;;  %772 = vmatprep.subr.mxu0 %v655_v25  ;;  %v713_v7 = vld [vmem:[#allocation4 + $0x3a8] sm:$0xff]  ;;  %v632_v8 = vld [vmem:[#allocation4 + $0x120] sm:$0xff]  ;;  %v631_v10 = vld [vmem:[#allocation4 + $0x118] sm:$0xff] }
  0x73   : > { %820 = vmatpush1.msra.mxu1 %v678_v14  ;;  %773 = vmatpush2.msra.mxu0 %v654_v27  ;;  %v712_v9 = vld [vmem:[#allocation4 + $0x3a0] sm:$0xff]  ;;  %v711_v11 = vld [vmem:[#allocation4 + $0x398] sm:$0xff]  ;;  %v630_v12 = vld [vmem:[#allocation4 + $0x110] sm:$0xff] }
  0x74   : > { %821 = vmatprep.subr.mxu1 %v677_v16  ;;  %774 = vmatprep.subr.mxu0 %v653_v29  ;;  %v710_v13 = vld [vmem:[#allocation4 + $0x390] sm:$0xff]  ;;  %v629_v14 = vld [vmem:[#allocation4 + $0x108] sm:$0xff]  ;;  %v628_v16 = vld [vmem:[#allocation4 + $0x100] sm:$0xff] }
  0x75   : > { %822 = vmatpush1.msra.mxu1 %v676_v18  ;;  %775 = vmatpush2.msra.mxu0 %v652_v31  ;;  %v709_v15 = vld [vmem:[#allocation4 + $0x388] sm:$0xff]  ;;  %v708_v17 = vld [vmem:[#allocation4 + $0x380] sm:$0xff]  ;;  %v707_v18 = vld [vmem:[#allocation4 + $0x378] sm:$0xff] }
  0x76   : > { %823 = vmatprep.subr.mxu1 %v675_v20  ;;  %776 = vmatprep.subr.mxu0 %v651_v33  ;;  %v706_v19 = vld [vmem:[#allocation4 + $0x370] sm:$0xff]  ;;  %v705_v20 = vld [vmem:[#allocation4 + $0x368] sm:$0xff]  ;;  %v704_v21 = vld [vmem:[#allocation4 + $0x360] sm:$0xff] }
  0x77   : > { %824 = vmatpush1.msra.mxu1 %v674_v22  ;;  %777 = vmatpush2.msra.mxu0 %v650_v35  ;;  %v703_v22 = vld [vmem:[#allocation4 + $0x358] sm:$0xff]  ;;  %v702_v23 = vld [vmem:[#allocation4 + $0x350] sm:$0xff]  ;;  %v700_v25 = vld [vmem:[#allocation4 + $0x340] sm:$0xff]  ;;  %v422_v35 = vlaneseq }
  0x78   : > { %825 = vmatprep.subr.mxu1 %v673_v24  ;;  %778 = vmatprep.subr.mxu0 %v649_v37  ;;  %v701_v24 = vld [vmem:[#allocation4 + $0x348] sm:$0xff]  ;;  %v698_v27 = vld [vmem:[#allocation4 + $0x330] sm:$0xff]  ;;  %v696_v29 = vld [vmem:[#allocation4 + $0x320] sm:$0xff] }
  0x79   : > { %826 = vmatpush1.msra.mxu1 %v672_v26  ;;  %779 = vmatpush2.msra.mxu0 %v648_v39  ;;  %v699_v26 = vld [vmem:[#allocation4 + $0x338] sm:$0xff]  ;;  %v694_v31 = vld [vmem:[#allocation4 + $0x310] sm:$0xff]  ;;  %v692_v33 = vld [vmem:[#allocation4 + $0x300] sm:$0xff] }
  0x7a   : > { %827 = vmatprep.subr.mxu1 %v671_v28  ;;  %780 = vmatprep.subr.mxu0 %v647_v41  ;;  %v697_v28 = vld [vmem:[#allocation4 + $0x328] sm:$0xff] }
  0x7b   : > { %828 = vmatpush1.msra.mxu1 %v670_v30  ;;  %781 = vmatpush2.msra.mxu0 %v646_v43  ;;  %v695_v30 = vld [vmem:[#allocation4 + $0x318] sm:$0xff] }
  0x7c   : > { %829 = vmatprep.subr.mxu1 %v669_v32  ;;  %782 = vmatprep.subr.mxu0 %v645_v45  ;;  %v693_v32 = vld [vmem:[#allocation4 + $0x308] sm:$0xff] }
  0x7d   : > { %830 = vmatpush1.msra.mxu1 %v668_v34  ;;  %783 = vmatpush2.msra.mxu0 %v644_v47  ;;  %v913_v34 = vld [vmem:[#allocation6 + $0xf8] sm:$0xff] }
  0x7e   : > { %831 = vmatprep.subr.mxu1 %v667_v36  ;;  %784 = vmatprep.subr.mxu0 %v643_v49  ;;  %v423_v36 = vshrl.u32 %v422_v35, 7  ;;  %v939_v35 = vld [vmem:[#allocation6 + $0x1c8] sm:$0xff] }
  0x7f   : > { %832 = vmatpush1.msra.mxu1 %v666_v38  ;;  %785 = vmatpush2.msra.mxu0 %v642_v51  ;;  %v420_v38 = vld [vmem:[%s1668_s2] sm:$0xf] }
  0x80   : > { %833 = vmatprep.subr.mxu1 %v665_v40  ;;  %786 = vmatprep.subr.mxu0 %v641_v53  ;;  %v1636_v37 = vsub.s32 0, %v423_v36  ;;  %v1641_v39 = vsub.s32 1, %v423_v36  ;;  %v432_v51 = vsub.s32 2, %v423_v36  ;;  %v910_v53 = vld [vmem:[#allocation6 + $0xe0] sm:$0xff] }
  0x81   : > { %834 = vmatpush1.msra.mxu1 %v664_v42  ;;  %787 = vmatpush2.msra.mxu0 %v640_v55  ;;  %v909_v55 = vld [vmem:[#allocation6 + $0xd8] sm:$0xff] }
  0x82   : > { %835 = vmatprep.subr.mxu1 %v663_v44  ;;  %788 = vmatprep.subr.mxu0 %v639_v57  ;;  %v425_v40 = vrot.slane %v420_v38, %v1636_v37  ;;  %v429_v41 = vrot.slane %v420_v38, %v1641_v39  ;;  %v433_v57 = vrot.slane %v420_v38, %v432_v51  ;;  %v925_v51 = vld [vmem:[#allocation6 + $0x158] sm:$0xff] }
  0x83   : > { %836 = vmatpush1.msra.mxu1 %v662_v46  ;;  %789 = vmatpush2.msra.mxu0 %v638_v59  ;;  %v906_v59 = vld [vmem:[#allocation6 + $0xc0] sm:$0xff] }
  0x84   : > { %837 = vmatprep.subr.mxu1 %v661_v48  ;;  %790 = vmatprep.subr.mxu0 %v637_v62 }
  0x85   : > { %838 = vmatpush1.msra.mxu1 %v660_v50  ;;  %791 = vmatpush2.msra.mxu0 %v636_v0  ;;  %v912_v50 = vld [vmem:[#allocation6 + $0xf0] sm:$0xff] }
  0x86   : > { %839 = vmatprep.subr.mxu1 %v723_v52  ;;  %792 = vmatprep.subr.mxu0 %v635_v2  ;;  %v911_v52 = vld [vmem:[#allocation6 + $0xe8] sm:$0xff] }
  0x87   : > { %840 = vmatpush2.msra.mxu1 %v722_v54  ;;  %793 = vmatpush2.msra.mxu0 %v634_v4  ;;  %v436_v54 = vsub.s32 3, %v423_v36  ;;  %v938_v36 = vld [vmem:[#allocation6 + $0x1c0] sm:$0xff] }
  0x88   : > { %841 = vmatprep.subr.mxu1 %v721_v56  ;;  %794 = vmatprep.subr.mxu0 %v633_v6  ;;  %v908_v56 = vld [vmem:[#allocation6 + $0xd0] sm:$0xff] }
  0x89   : > { %842 = vmatpush2.msra.mxu1 %v720_v58  ;;  %795 = vmatpush2.msra.mxu0 %v632_v8  ;;  %v907_v58 = vld [vmem:[#allocation6 + $0xc8] sm:$0xff] }
  0x8a   : > { %843 = vmatprep.subr.mxu1 %v719_v60  ;;  %796 = vmatprep.subr.mxu0 %v631_v10  ;;  %v437_v60 = vrot.slane %v420_v38, %v436_v54  ;;  %v898_v10 = vld [vmem:[#allocation6 + $0x80] sm:$0xff]  ;;  %v937_v38 = vld [vmem:[#allocation6 + $0x1b8] sm:$0xff] }
  0x8b   : > { %844 = vmatpush2.msra.mxu1 %v718_v61  ;;  %797 = vmatpush2.msra.mxu0 %v630_v12  ;;  %v905_v61 = vld [vmem:[#allocation6 + $0xb8] sm:$0xff]  ;;  %v922_v54 = vld [vmem:[#allocation6 + $0x140] sm:$0xff] }
  0x8c   : > { %845 = vmatprep.subr.mxu1 %v717_v63  ;;  %798 = vmatprep.subr.mxu0 %v629_v14  ;;  %v904_v63 = vld [vmem:[#allocation6 + $0xb0] sm:$0xff]  ;;  %v897_v12 = vld [vmem:[#allocation6 + $0x78] sm:$0xff] }
  0x8d   : > { %846 = vmatpush2.msra.mxu1 %v716_v1  ;;  %799 = vmatpush2.msra.mxu0 %v628_v16  ;;  %v903_v1 = vld [vmem:[#allocation6 + $0xa8] sm:$0xff]  ;;  %v896_v14 = vld [vmem:[#allocation6 + $0x70] sm:$0xff]  ;;  %v894_v16 = vld [vmem:[#allocation6 + $0x60] sm:$0xff] }
  0x8e   : > { %847 = vmatprep.subr.mxu1 %v715_v3  ;;  %958 = vmatprep.subr.mxu0 %v913_v34  ;;  %v902_v3 = vld [vmem:[#allocation6 + $0xa0] sm:$0xff]  ;;  %v940_v34 = vld [vmem:[#allocation6 + $0x1d0] sm:$0xff] }
  0x8f   : > { %848 = vmatpush2.msra.mxu1 %v714_v5  ;;  %v901_v5 = vld [vmem:[#allocation6 + $0x98] sm:$0xff] }
  0x90   : > { %849 = vmatprep.subr.mxu1 %v713_v7  ;;  %v900_v7 = vld [vmem:[#allocation6 + $0x90] sm:$0xff] }
  0x91   : > { %850 = vmatpush2.msra.mxu1 %v712_v9  ;;  %v899_v9 = vld [vmem:[#allocation6 + $0x88] sm:$0xff] }
  0x92   : > { %851 = vmatprep.subr.mxu1 %v711_v11 }
  0x93   : > { %852 = vmatpush2.msra.mxu1 %v710_v13 }
  0x94   : > { %853 = vmatprep.subr.mxu1 %v709_v15  ;;  %v895_v15 = vld [vmem:[#allocation6 + $0x68] sm:$0xff] }
  0x95   : > { %854 = vmatpush2.msra.mxu1 %v708_v17  ;;  %v893_v17 = vld [vmem:[#allocation6 + $0x58] sm:$0xff] }
  0x96   : > { %855 = vmatprep.subr.mxu1 %v707_v18  ;;  %v892_v18 = vld [vmem:[#allocation6 + $0x50] sm:$0xff] }
  0x97   : > { %856 = vmatpush2.msra.mxu1 %v706_v19  ;;  %v891_v19 = vld [vmem:[#allocation6 + $0x48] sm:$0xff] }
  0x98   : > { %857 = vmatprep.subr.mxu1 %v705_v20  ;;  %v890_v20 = vld [vmem:[#allocation6 + $0x40] sm:$0xff] }
  0x99   : > { %858 = vmatpush2.msra.mxu1 %v704_v21  ;;  %v889_v21 = vld [vmem:[#allocation6 + $0x38] sm:$0xff] }
  0x9a   : > { %859 = vmatprep.subr.mxu1 %v703_v22  ;;  %v888_v22 = vld [vmem:[#allocation6 + $0x30] sm:$0xff] }
  0x9b   : > { %860 = vmatpush2.msra.mxu1 %v702_v23  ;;  %v887_v23 = vld [vmem:[#allocation6 + $0x28] sm:$0xff] }
  0x9c   : > { %861 = vmatprep.subr.mxu1 %v701_v24  ;;  %v886_v24 = vld [vmem:[#allocation6 + $0x20] sm:$0xff] }
  0x9d   : > { %862 = vmatpush2.msra.mxu1 %v700_v25  ;;  %v885_v25 = vld [vmem:[#allocation6 + $0x18] sm:$0xff] }
  0x9e   : > { %863 = vmatprep.subr.mxu1 %v699_v26  ;;  %v884_v26 = vld [vmem:[#allocation6 + $0x10] sm:$0xff] }
  0x9f   : > { %864 = vmatpush2.msra.mxu1 %v698_v27  ;;  %v883_v27 = vld [vmem:[#allocation6 + $0x8] sm:$0xff] }
  0xa0   : > { %865 = vmatprep.subr.mxu1 %v697_v28  ;;  %v882_v28 = vld [vmem:[#allocation6] sm:$0xff] }
  0xa1   : > { %866 = vmatpush2.msra.mxu1 %v696_v29  ;;  %v945_v29 = vld [vmem:[#allocation6 + $0x1f8] sm:$0xff] }
  0xa2   : > { %867 = vmatprep.subr.mxu1 %v695_v30  ;;  %v944_v30 = vld [vmem:[#allocation6 + $0x1f0] sm:$0xff] }
  0xa3   : > { %868 = vmatpush2.msra.mxu1 %v694_v31  ;;  %v943_v31 = vld [vmem:[#allocation6 + $0x1e8] sm:$0xff] }
  0xa4   : > { %869 = vmatprep.subr.mxu1 %v693_v32  ;;  %v942_v32 = vld [vmem:[#allocation6 + $0x1e0] sm:$0xff] }
  0xa5   : > { %870 = vmatpush2.msra.mxu1 %v692_v33  ;;  %v941_v33 = vld [vmem:[#allocation6 + $0x1d8] sm:$0xff] }
 0x116   : > { %v512_v42 = vpop.f32.mrf.mxu1 }
 0x117   : > { %v513_v43 = vadd.f32 %v512_v42, %v425_v40  ;;  %v936_v40 = vld [vmem:[#allocation6 + $0x1b0] sm:$0xff]  ;;  %v934_v42 = vld [vmem:[#allocation6 + $0x1a0] sm:$0xff] }
 0x118   : > { %v514_v44 = vpop.f32.mrf.mxu1 }
 0x119   : > { %v515_v45 = vadd.f32 %v514_v44, %v429_v41  ;;  %v588_v46 = vmul.f32 0.01, %v513_v43  ;;  %v935_v41 = vld [vmem:[#allocation6 + $0x1a8] sm:$0xff]  ;;  %v932_v44 = vld [vmem:[#allocation6 + $0x190] sm:$0xff] }
 0x11b   : > { %v589_v47 = vmul.f32 0.01, %v515_v45  ;;  %v592_v49 = vmax.f32 %v513_v43, %v588_v46  ;;  %v933_v43 = vld [vmem:[#allocation6 + $0x198] sm:$0xff]  ;;  %v930_v46 = vld [vmem:[#allocation6 + $0x180] sm:$0xff] }
 0x11d   : > { %v593_v48 = vmax.f32 %v515_v45, %v589_v47  ;;  %v931_v45 = vld [vmem:[#allocation6 + $0x188] sm:$0xff]  ;;  %v929_v47 = vld [vmem:[#allocation6 + $0x178] sm:$0xff] }
 0x11f   : > { %800 = vmatprep.mubr.f32.mxu0 %v593_v48  ;;  %v928_v48 = vld [vmem:[#allocation6 + $0x170] sm:$0xff] }
 0x120   : > { %801 = vmatmul.mubr.f32.vlgmr.msra.gmra.mxu0 %v592_v49  ;;  %v927_v49 = vld [vmem:[#allocation6 + $0x168] sm:$0xff] }
 0x121   : > { %959 = vmatpush1.msra.mxu0 %v912_v50  ;;  %v926_v50 = vld [vmem:[#allocation6 + $0x160] sm:$0xff] }
 0x122   : > { %960 = vmatprep.subr.mxu0 %v911_v52  ;;  %v924_v52 = vld [vmem:[#allocation6 + $0x150] sm:$0xff] }
 0x123   : > { %961 = vmatpush1.msra.mxu0 %v910_v53  ;;  %v923_v53 = vld [vmem:[#allocation6 + $0x148] sm:$0xff] }
 0x124   : > { %962 = vmatprep.subr.mxu0 %v909_v55  ;;  %v921_v55 = vld [vmem:[#allocation6 + $0x138] sm:$0xff] }
 0x125   : > { %963 = vmatpush1.msra.mxu0 %v908_v56  ;;  %v920_v56 = vld [vmem:[#allocation6 + $0x130] sm:$0xff] }
 0x126   : > { %v583_v62 = vpop.f32.mrf.mxu1  ;;  %964 = vmatprep.subr.mxu0 %v907_v58  ;;  %v918_v58 = vld [vmem:[#allocation6 + $0x120] sm:$0xff] }
 0x127   : > { %v584_v0 = vadd.f32 %v583_v62, %v433_v57  ;;  %965 = vmatpush1.msra.mxu0 %v906_v59  ;;  %v919_v57 = vld [vmem:[#allocation6 + $0x128] sm:$0xff]  ;;  %v917_v59 = vld [vmem:[#allocation6 + $0x118] sm:$0xff]  ;;  %v914_v62 = vld [vmem:[#allocation6 + $0x100] sm:$0xff] }
 0x128   : > { %v585_v2 = vpop.f32.mrf.mxu1  ;;  %966 = vmatprep.subr.mxu0 %v905_v61  ;;  %v915_v61 = vld [vmem:[#allocation6 + $0x108] sm:$0xff] }
 0x129   : > { %v586_v4 = vadd.f32 %v585_v2, %v437_v60  ;;  %967 = vmatpush1.msra.mxu0 %v904_v63  ;;  %v590_v6 = vmul.f32 0.01, %v584_v0  ;;  %v916_v60 = vld [vmem:[#allocation6 + $0x110] sm:$0xff]  ;;  %v1064_v63 = vld [vmem:[#allocation7 + $0xf8] sm:$0xff] }
 0x12a   : > { %968 = vmatprep.subr.mxu0 %v903_v1  ;;  %v1063_v1 = vld [vmem:[#allocation7 + $0xf0] sm:$0xff]  ;;  %1257 = vmatprep.subr.mxu1 %v1064_v63 }
 0x12b   : > { %v591_v8 = vmul.f32 0.01, %v586_v4  ;;  %969 = vmatpush1.msra.mxu0 %v902_v3  ;;  %v594_v13 = vmax.f32 %v584_v0, %v590_v6  ;;  %v1048_v0 = vld [vmem:[#allocation7 + $0x78] sm:$0xff]  ;;  %v1047_v2 = vld [vmem:[#allocation7 + $0x70] sm:$0xff]  ;;  %v1062_v3 = vld [vmem:[#allocation7 + $0xe8] sm:$0xff] }
 0x12c   : > { %970 = vmatprep.subr.mxu0 %v901_v5  ;;  %v1061_v5 = vld [vmem:[#allocation7 + $0xe0] sm:$0xff] }
 0x12d   : > { %v595_v11 = vmax.f32 %v586_v4, %v591_v8  ;;  %971 = vmatpush1.msra.mxu0 %v900_v7  ;;  %v1046_v4 = vld [vmem:[#allocation7 + $0x68] sm:$0xff]  ;;  %v1045_v6 = vld [vmem:[#allocation7 + $0x60] sm:$0xff]  ;;  %v1060_v7 = vld [vmem:[#allocation7 + $0xd8] sm:$0xff] }
 0x12e   : > { %972 = vmatprep.subr.mxu0 %v899_v9  ;;  %v1044_v8 = vld [vmem:[#allocation7 + $0x58] sm:$0xff]  ;;  %v1059_v9 = vld [vmem:[#allocation7 + $0xd0] sm:$0xff] }
 0x12f   : > { %871 = vmatprep.mubr.f32.mxu1 %v595_v11  ;;  %973 = vmatpush1.msra.mxu0 %v898_v10  ;;  %v1043_v10 = vld [vmem:[#allocation7 + $0x50] sm:$0xff]  ;;  %v1058_v11 = vld [vmem:[#allocation7 + $0xc8] sm:$0xff] }
 0x130   : > { %872 = vmatmul.mubr.f32.vlgmr.msra.gmra.mxu1 %v594_v13  ;;  %974 = vmatprep.subr.mxu0 %v897_v12  ;;  %v1042_v12 = vld [vmem:[#allocation7 + $0x48] sm:$0xff]  ;;  %v1057_v13 = vld [vmem:[#allocation7 + $0xc0] sm:$0xff] }
 0x131   : > { %975 = vmatpush1.msra.mxu0 %v896_v14  ;;  %1258 = vmatpush3.msra.mxu1 %v1048_v0  ;;  %v1041_v14 = vld [vmem:[#allocation7 + $0x40] sm:$0xff] }
 0x132   : > { %976 = vmatprep.subr.mxu0 %v895_v15  ;;  %1259 = vmatprep.subr.mxu1 %v1063_v1  ;;  %v1056_v15 = vld [vmem:[#allocation7 + $0xb8] sm:$0xff] }
 0x133   : > { %977 = vmatpush1.msra.mxu0 %v894_v16  ;;  %1260 = vmatpush3.msra.mxu1 %v1047_v2  ;;  %v1040_v16 = vld [vmem:[#allocation7 + $0x38] sm:$0xff] }
 0x134   : > { %978 = vmatprep.subr.mxu0 %v893_v17  ;;  %1261 = vmatprep.subr.mxu1 %v1062_v3  ;;  %v1055_v17 = vld [vmem:[#allocation7 + $0xb0] sm:$0xff] }
 0x135   : > { %979 = vmatpush1.msra.mxu0 %v892_v18  ;;  %1262 = vmatpush3.msra.mxu1 %v1046_v4  ;;  %v1039_v18 = vld [vmem:[#allocation7 + $0x30] sm:$0xff] }
 0x136   : > { %980 = vmatprep.subr.mxu0 %v891_v19  ;;  %1263 = vmatprep.subr.mxu1 %v1061_v5  ;;  %v1054_v19 = vld [vmem:[#allocation7 + $0xa8] sm:$0xff] }
 0x137   : > { %981 = vmatpush1.msra.mxu0 %v890_v20  ;;  %1264 = vmatpush3.msra.mxu1 %v1045_v6  ;;  %v1038_v20 = vld [vmem:[#allocation7 + $0x28] sm:$0xff] }
 0x138   : > { %982 = vmatprep.subr.mxu0 %v889_v21  ;;  %1265 = vmatprep.subr.mxu1 %v1060_v7  ;;  %v724_v21 = vld [vmem:[%s1670_s4] sm:$0x3] }
 0x139   : > { %983 = vmatpush1.msra.mxu0 %v888_v22  ;;  %1266 = vmatpush3.msra.mxu1 %v1044_v8 }
 0x13a   : > { %984 = vmatprep.subr.mxu0 %v887_v23  ;;  %1267 = vmatprep.subr.mxu1 %v1059_v9  ;;  %v729_v23 = vrot.slane %v724_v21, %v1636_v37 }
 0x13b   : > { %985 = vmatpush1.msra.mxu0 %v886_v24  ;;  %1268 = vmatpush3.msra.mxu1 %v1043_v10  ;;  %v733_v24 = vrot.slane %v724_v21, %v1641_v39 }
 0x13c   : > { %986 = vmatprep.subr.mxu0 %v885_v25  ;;  %1269 = vmatprep.subr.mxu1 %v1058_v11 }
 0x13d   : > { %987 = vmatpush1.msra.mxu0 %v884_v26  ;;  %1270 = vmatpush3.msra.mxu1 %v1042_v12 }
 0x13e   : > { %988 = vmatprep.subr.mxu0 %v883_v27  ;;  %1271 = vmatprep.subr.mxu1 %v1057_v13 }
 0x13f   : > { %989 = vmatpush1.msra.mxu0 %v882_v28  ;;  %1272 = vmatpush3.msra.mxu1 %v1041_v14 }
 0x140   : > { %990 = vmatprep.subr.mxu0 %v945_v29  ;;  %1273 = vmatprep.subr.mxu1 %v1056_v15 }
 0x141   : > { %991 = vmatpush2.msra.mxu0 %v944_v30  ;;  %1274 = vmatpush3.msra.mxu1 %v1040_v16 }
 0x142   : > { %992 = vmatprep.subr.mxu0 %v943_v31  ;;  %1275 = vmatprep.subr.mxu1 %v1055_v17 }
 0x143   : > { %993 = vmatpush2.msra.mxu0 %v942_v32  ;;  %1276 = vmatpush3.msra.mxu1 %v1039_v18 }
 0x144   : > { %994 = vmatprep.subr.mxu0 %v941_v33  ;;  %1277 = vmatprep.subr.mxu1 %v1054_v19 }
 0x145   : > { %995 = vmatpush2.msra.mxu0 %v940_v34  ;;  %1278 = vmatpush3.msra.mxu1 %v1038_v20 }
 0x146   : > { %996 = vmatprep.subr.mxu0 %v939_v35 }
 0x147   : > { %997 = vmatpush2.msra.mxu0 %v938_v36  ;;  %v1053_v36 = vld [vmem:[#allocation7 + $0xa0] sm:$0xff] }
 0x148   : > { %998 = vmatprep.subr.mxu0 %v937_v38  ;;  %1279 = vmatprep.subr.mxu1 %v1053_v36  ;;  %v1037_v38 = vld [vmem:[#allocation7 + $0x20] sm:$0xff] }
 0x149   : > { %999 = vmatpush2.msra.mxu0 %v936_v40  ;;  %1280 = vmatpush3.msra.mxu1 %v1037_v38  ;;  %v1052_v40 = vld [vmem:[#allocation7 + $0x98] sm:$0xff] }
 0x14a   : > { %1000 = vmatprep.subr.mxu0 %v935_v41  ;;  %1281 = vmatprep.subr.mxu1 %v1052_v40  ;;  %v1036_v41 = vld [vmem:[#allocation7 + $0x18] sm:$0xff] }
 0x14b   : > { %1001 = vmatpush2.msra.mxu0 %v934_v42  ;;  %1282 = vmatpush3.msra.mxu1 %v1036_v41  ;;  %v1051_v42 = vld [vmem:[#allocation7 + $0x90] sm:$0xff] }
 0x14c   : > { %1002 = vmatprep.subr.mxu0 %v933_v43  ;;  %1283 = vmatprep.subr.mxu1 %v1051_v42  ;;  %v1035_v43 = vld [vmem:[#allocation7 + $0x10] sm:$0xff] }
 0x14d   : > { %1003 = vmatpush2.msra.mxu0 %v932_v44  ;;  %1284 = vmatpush3.msra.mxu1 %v1035_v43  ;;  %v1050_v44 = vld [vmem:[#allocation7 + $0x88] sm:$0xff] }
 0x14e   : > { %1004 = vmatprep.subr.mxu0 %v931_v45  ;;  %1285 = vmatprep.subr.mxu1 %v1050_v44  ;;  %v1034_v45 = vld [vmem:[#allocation7 + $0x8] sm:$0xff] }
 0x14f   : > { %1005 = vmatpush2.msra.mxu0 %v930_v46  ;;  %1286 = vmatpush3.msra.mxu1 %v1034_v45  ;;  %v1049_v46 = vld [vmem:[#allocation7 + $0x80] sm:$0xff] }
 0x150   : > { %1006 = vmatprep.subr.mxu0 %v929_v47  ;;  %v1033_v47 = vld [vmem:[#allocation7] sm:$0xff]  ;;  %1287 = vmatprep.subr.mxu1 %v1049_v46 }
 0x151   : > { %1007 = vmatpush2.msra.mxu0 %v928_v48  ;;  %1288 = vmatpush3.msra.mxu1 %v1033_v47  ;;  %v946_v48 = vld [vmem:[%s1672_s6] sm:$0x3] }
 0x152   : > { %1008 = vmatprep.subr.mxu0 %v927_v49  ;;  %v951_v49 = vrot.slane %v946_v48, %v1636_v37 }
 0x153   : > { %1009 = vmatpush2.msra.mxu0 %v926_v50  ;;  %v955_v50 = vrot.slane %v946_v48, %v1641_v39 }
 0x154   : > { %1010 = vmatprep.subr.mxu0 %v925_v51 }
 0x155   : > { %1011 = vmatpush2.msra.mxu0 %v924_v52 }
 0x156   : > { %1012 = vmatprep.subr.mxu0 %v923_v53 }
 0x157   : > { %1013 = vmatpush2.msra.mxu0 %v922_v54 }
 0x158   : > { %1014 = vmatprep.subr.mxu0 %v921_v55 }
 0x159   : > { %1015 = vmatpush2.msra.mxu0 %v920_v56 }
 0x15a   : > { %1016 = vmatprep.subr.mxu0 %v919_v57 }
 0x15b   : > { %1017 = vmatpush2.msra.mxu0 %v918_v58 }
 0x15c   : > { %1018 = vmatprep.subr.mxu0 %v917_v59 }
 0x15d   : > { %1019 = vmatpush2.msra.mxu0 %v916_v60  ;;  %v1254_v60 = vld [vmem:[%s1674_s8] ss:$0 sm:$0xff] }
 0x15e   : > { %1020 = vmatprep.subr.mxu0 %v915_v61 }
 0x15f   : > { %1021 = vmatpush2.msra.mxu0 %v914_v62 }
 0x1e0   : > { %v802_v22 = vpop.f32.mrf.mxu0 }
 0x1e1   : > { %v803_v26 = vadd.f32 %v802_v22, %v729_v23 }
 0x1e2   : > { %v804_v25 = vpop.f32.mrf.mxu0 }
 0x1e3   : > { %v805_v28 = vadd.f32 %v804_v25, %v733_v24 }
 0x1f0   : > { %v873_v27 = vpop.f32.mrf.mxu1 }
 0x1f1   : > { %v874_v29 = vadd.f32 %v873_v27, %v803_v26 }
 0x1f2   : > { %v875_v30 = vpop.f32.mrf.mxu1 }
 0x1f3   : > { %v876_v31 = vadd.f32 %v875_v30, %v805_v28  ;;  %v878_v32 = vmul.f32 0.01, %v874_v29 }
 0x1f5   : > { %v879_v33 = vmul.f32 0.01, %v876_v31  ;;  %v880_v35 = vmax.f32 %v874_v29, %v878_v32 }
 0x1f7   : > { %v881_v34 = vmax.f32 %v876_v31, %v879_v33 }
 0x1f9   : > { %1022 = vmatprep.mubr.f32.mxu0 %v881_v34 }
 0x1fa   : > { %1023 = vmatmul.mubr.f32.vlgmr.msra.gmra.mxu0 %v880_v35 }
 0x2ba   : > { %v1024_v51 = vpop.f32.mrf.mxu0 }
 0x2bb   : > { %v1025_v52 = vadd.f32 %v1024_v51, %v951_v49 }
 0x2bc   : > { %v1026_v53 = vpop.f32.mrf.mxu0 }
 0x2bd   : > { %v1027_v54 = vadd.f32 %v1026_v53, %v955_v50  ;;  %v1029_v55 = vmul.f32 0.01, %v1025_v52 }
 0x2bf   : > { %v1030_v56 = vmul.f32 0.01, %v1027_v54  ;;  %v1031_v58 = vmax.f32 %v1025_v52, %v1029_v55 }
 0x2c1   : > { %v1032_v57 = vmax.f32 %v1027_v54, %v1030_v56 }
 0x2c3   : > { %1136 = vmatprep.mubr.f32.mxu1 %v1032_v57 }
 0x2c4   : > { %1137 = vmatmul.mubr.f32.vlgmr.msra.gmra.mxu1 %v1031_v58 }
 0x384   : > { %v1289_v59 = vpop.f32.mrf.mxu1 }
 0x386   : > { %v1290_v61 = vpop.f32.mrf.mxu1 }
 0x387   : > { %v1291_v37 = vadd.f32 %v1290_v61, %v1289_v59 }
 0x389   : > { %v1139_v39 = vadd.f32 %v1291_v37, %v1254_v60 }
 0x38b   : > { %1142 = vst [vmem:[%s386_s17] sm:$0xff] %v1139_v39 }
 0x38c PF: > { %s22_s30 = sadd.s32 1, %s1470_s30  }
 0x38d   : > { %p19_p2 = scmp.ge.s32.totalorder %s22_s30, 4  }
 0x38f   :  { %21 = sbr.rel (!%p19_p2) target bundleno = 3 (0x3), region = 103 }
 0x394   :  { %1162 = vsyncpa [#allocation3], 1 }
 0x395   :  { %1164 = vsyncpa [#allocation3 + $0x1], 1 }
 0x396   :  { %1165 = vsyncpa [#allocation5], 1 }
 0x397   :  { %1166 = vsyncpa [#allocation8], 1 }

</bundles_post_ra>
